<compile_context>
chip_gen: v6e
topology: v6e:2x2x1
jax: 0.10.0
libtpu: 0.0.40
codegen_flags: <defaults>
</compile_context>

<pallas_src>
import jax
import jax.numpy as jnp
from jax.experimental import pallas as pl
from jax.experimental.pallas import tpu as pltpu

_BLOCK_BYTES = 4 << 20           # ~4 MiB per input block (read side)
_VMEM_LIMIT = 32 << 20           # in+out double buffered ~= 16 MiB; safe v5e..v7x
_LANE_CANDIDATES = (8192, 4096, 2048, 1024, 512, 256, 128)


def _swish_kernel(beta_ref, x_ref, o_ref):
    # beta_ref: (1, 1) f32 scalar in SMEM; x_ref/o_ref: VMEM tiles (2-D or 1-D).
    beta = beta_ref[0, 0]
    x = x_ref[...].astype(jnp.float32)
    # sigmoid(z) == 0.5 * (tanh(z / 2) + 1): a single EUP push per element.
    sig = 0.5 * (jnp.tanh(0.5 * (beta * x)) + 1.0)
    o_ref[...] = (x * sig).astype(o_ref.dtype)


# CORE_PARALLEL actually engages v7x's second TensorCore; "parallel" is the
# portable fallback (single-TC chips / interpret mode).
_SEM_CANDIDATES = tuple(
    s for s in (getattr(pltpu, "CORE_PARALLEL", None), "parallel") if s is not None
)
_SEM_CACHE = []  # remembers the first dimension_semantics value that lowered OK


def _run_with_semantics(build_and_call):
    order = list(_SEM_CACHE) + [s for s in _SEM_CANDIDATES if s not in _SEM_CACHE]
    last_err = None
    for sem in order:
        try:
            out = build_and_call(sem)
            if not _SEM_CACHE:
                _SEM_CACHE.append(sem)
            else:
                _SEM_CACHE[0] = sem
            return out
        except Exception as err:  # lowering rejected this semantics; try next
            last_err = err
    raise last_err


def swish_pallas(x, beta):
    """Elementwise x * sigmoid(beta * x). Any shape, any float dtype."""
    orig_shape = x.shape
    dtype = x.dtype
    n = x.size
    itemsize = jnp.dtype(dtype).itemsize
    beta_arr = jnp.asarray(beta, dtype=jnp.float32).reshape(1, 1)

    lane = next((c for c in _LANE_CANDIDATES if n % c == 0), None)

    if lane is not None:
        # ---- Fast path: lane-dense 2-D slab, row-tiled 1-D grid. ----
        rows = n // lane
        align = max(8, 32 // itemsize)            # 8 rows f32, 16 rows bf16
        tile_r = max(align, (_BLOCK_BYTES // (lane * itemsize)) // align * align)
        if tile_r >= rows:
            tile_r = rows                         # single full-array block
        grid = pl.cdiv(rows, tile_r)              # partial last block is masked
        x2d = x.reshape(rows, lane)

        def call2d(sem):
            return pl.pallas_call(
                _swish_kernel,
                out_shape=jax.ShapeDtypeStruct((rows, lane), dtype),
                grid_spec=pltpu.PrefetchScalarGridSpec(
                    num_scalar_prefetch=0,
                    grid=(grid,),
                    in_specs=[
                        pl.BlockSpec(memory_space=pltpu.MemorySpace.SMEM),  # beta
                        pl.BlockSpec((tile_r, lane), lambda i: (i, 0)),     # x tiles
                    ],
                    out_specs=pl.BlockSpec((tile_r, lane), lambda i: (i, 0)),
                ),
                compiler_params=pltpu.CompilerParams(
                    dimension_semantics=(sem,),
                    vmem_limit_bytes=_VMEM_LIMIT,
                ),
            )(beta_arr, x2d)

        out2d = _run_with_semantics(call2d)
        return out2d.reshape(orig_shape)

    # ---- Fallback (element count not a multiple of 128): flat 1-D grid. ----
    # No jnp.pad / final slice: the last partial block is masked by Pallas, so
    # the odd-size path moves exactly the same HBM bytes as the fast path.
    xf = x.reshape(-1)
    chunk = max(1024, (_BLOCK_BYTES // itemsize) // 1024 * 1024)
    if chunk >= n:
        chunk = n                                 # single full-array block
    grid = pl.cdiv(n, chunk)

    def call1d(sem):
        return pl.pallas_call(
            _swish_kernel,
            out_shape=jax.ShapeDtypeStruct((n,), dtype),
            grid_spec=pltpu.PrefetchScalarGridSpec(
                num_scalar_prefetch=0,
                grid=(grid,),
                in_specs=[
                    pl.BlockSpec(memory_space=pltpu.MemorySpace.SMEM),  # beta
                    pl.BlockSpec((chunk,), lambda i: (i,)),             # x chunks
                ],
                out_specs=pl.BlockSpec((chunk,), lambda i: (i,)),
            ),
            compiler_params=pltpu.CompilerParams(
                dimension_semantics=(sem,),
                vmem_limit_bytes=_VMEM_LIMIT,
            ),
        )(beta_arr, xf)

    outf = _run_with_semantics(call1d)
    return outf.reshape(orig_shape)


if __name__ == "__main__":
    key = jax.random.PRNGKey(0)
    beta = jnp.float32(1.0)  # matches nn.Parameter(torch.tensor(1.0))

    # Primary check: NCHW f32 (batch=2, channels=4, 16x16), lane-dense path.
    x = jax.random.normal(key, (2, 4, 16, 16), dtype=jnp.float32)
    y = swish_pallas(x, beta)
    jax.block_until_ready(y)
    y_ref = x * jax.nn.sigmoid(beta * x)
    assert y.shape == x.shape and y.dtype == x.dtype
    assert jnp.max(jnp.abs(y - y_ref)) < 5e-5

    # Non-default beta (it is a learnable parameter in the torch module).
    y2 = swish_pallas(x, jnp.float32(1.7))
    jax.block_until_ready(y2)
    y2_ref = x * jax.nn.sigmoid(jnp.float32(1.7) * x)
    assert jnp.max(jnp.abs(y2 - y2_ref)) < 5e-5

    # bf16 I/O: native dtype end-to-end, f32 compute in-register. Reference is
    # evaluated on the same bf16-rounded inputs; tolerance covers the final
    # bf16 output rounding (~half an ulp at |y| ~ 4).
    xb = x.astype(jnp.bfloat16)
    yb = swish_pallas(xb, beta)
    jax.block_until_ready(yb)
    xb32 = xb.astype(jnp.float32)
    yb_ref32 = xb32 * jax.nn.sigmoid(beta * xb32)
    assert yb.dtype == jnp.bfloat16
    assert jnp.max(jnp.abs(yb.astype(jnp.float32) - yb_ref32)) < 3e-2

    # Odd element count (2*3*5*7 = 210): exercises the no-pad 1-D fallback.
    xo = jax.random.normal(jax.random.PRNGKey(1), (2, 3, 5, 7), dtype=jnp.float32)
    yo = swish_pallas(xo, beta)
    jax.block_until_ready(yo)
    yo_ref = xo * jax.nn.sigmoid(beta * xo)
    assert yo.shape == xo.shape and yo.dtype == xo.dtype
    assert jnp.max(jnp.abs(yo - yo_ref)) < 5e-5

    print("KERNEL_OK")
</pallas_src>

<mosaic_0001>
module attributes {stable_mosaic.version = 11 : i64} {
  func.func @_swish_kernel(%arg0: i32, %arg1: memref<1x1xf32, #tpu.memory_space<smem>>, %arg2: memref<1x2048xf32, #tpu.memory_space<vmem>>, %arg3: memref<1x2048xf32, #tpu.memory_space<vmem>>) attributes {dimension_semantics = [#tpu.dimension_semantics<core_parallel>], iteration_bounds = array<i64: 1>, scalar_prefetch = 0 : i64, scratch_operands = 0 : i64, tpu.core_type = #tpu.core_type<tc>, window_params = [{transform_indices = @transform_0, window_bounds = array<i64: 1, 1>}, {transform_indices = @transform_1, window_bounds = array<i64: 1, 2048>}, {transform_indices = @transform_2, window_bounds = array<i64: 1, 2048>}]} {
    %c0 = arith.constant 0 : index
    %c0_0 = arith.constant 0 : index
    %0 = memref.load %arg1[%c0, %c0_0] : memref<1x1xf32, #tpu.memory_space<smem>>
    %c0_1 = arith.constant 0 : index
    %c0_2 = arith.constant 0 : index
    %1 = vector.load %arg2[%c0_1, %c0_2] : memref<1x2048xf32, #tpu.memory_space<vmem>>, vector<1x2048xf32>
    %2 = vector.broadcast %0 : f32 to vector<1x2048xf32>
    %3 = arith.mulf %2, %1 : vector<1x2048xf32>
    %cst = arith.constant 5.000000e-01 : f32
    %4 = vector.broadcast %cst : f32 to vector<1x2048xf32>
    %5 = arith.mulf %4, %3 : vector<1x2048xf32>
    %6 = math.tanh %5 : vector<1x2048xf32>
    %cst_3 = arith.constant 1.000000e+00 : f32
    %7 = vector.broadcast %cst_3 : f32 to vector<1x2048xf32>
    %8 = arith.addf %6, %7 : vector<1x2048xf32>
    %cst_4 = arith.constant 5.000000e-01 : f32
    %9 = vector.broadcast %cst_4 : f32 to vector<1x2048xf32>
    %10 = arith.mulf %9, %8 : vector<1x2048xf32>
    %11 = arith.mulf %1, %10 : vector<1x2048xf32>
    %c0_5 = arith.constant 0 : index
    %c0_6 = arith.constant 0 : index
    %12 = vector.load %arg3[%c0_5, %c0_6] : memref<1x2048xf32, #tpu.memory_space<vmem>>, vector<1x2048xf32>
    tpu.vector_store %arg3[%c0_5, %c0_6], %11 {strides = array<i32>} : memref<1x2048xf32, #tpu.memory_space<vmem>>, vector<1x2048xf32>,
    return
  }
  func.func @transform_0(%arg0: i32) -> (i32, i32) {
    %c0_i32 = arith.constant 0 : i32
    %c0_i32_0 = arith.constant 0 : i32
    %c0_i32_1 = arith.constant 0 : i32
    return %c0_i32, %c0_i32_0 : i32, i32
  }
  func.func @transform_1(%arg0: i32) -> (i32, i32) {
    %c0_i32 = arith.constant 0 : i32
    %c0_i32_0 = arith.constant 0 : i32
    return %arg0, %c0_i32 : i32, i32
  }
  func.func @transform_2(%arg0: i32) -> (i32, i32) {
    %c0_i32 = arith.constant 0 : i32
    %c0_i32_0 = arith.constant 0 : i32
    return %arg0, %c0_i32 : i32, i32
  }
}

module attributes {stable_mosaic.version = 11 : i64} {
  func.func @_swish_kernel(%arg0: i32, %arg1: memref<1x1xf32, #tpu.memory_space<smem>>, %arg2: memref<1x2048xf32, #tpu.memory_space<vmem>>, %arg3: memref<1x2048xf32, #tpu.memory_space<vmem>>) attributes {dimension_semantics = [#tpu.dimension_semantics<parallel>], iteration_bounds = array<i64: 1>, scalar_prefetch = 0 : i64, scratch_operands = 0 : i64, tpu.core_type = #tpu.core_type<tc>, window_params = [{transform_indices = @transform_0, window_bounds = array<i64: 1, 1>}, {transform_indices = @transform_1, window_bounds = array<i64: 1, 2048>}, {transform_indices = @transform_2, window_bounds = array<i64: 1, 2048>}]} {
    %c0 = arith.constant 0 : index
    %c0_0 = arith.constant 0 : index
    %0 = memref.load %arg1[%c0, %c0_0] : memref<1x1xf32, #tpu.memory_space<smem>>
    %c0_1 = arith.constant 0 : index
    %c0_2 = arith.constant 0 : index
    %1 = vector.load %arg2[%c0_1, %c0_2] : memref<1x2048xf32, #tpu.memory_space<vmem>>, vector<1x2048xf32>
    %2 = vector.broadcast %0 : f32 to vector<1x2048xf32>
    %3 = arith.mulf %2, %1 : vector<1x2048xf32>
    %cst = arith.constant 5.000000e-01 : f32
    %4 = vector.broadcast %cst : f32 to vector<1x2048xf32>
    %5 = arith.mulf %4, %3 : vector<1x2048xf32>
    %6 = math.tanh %5 : vector<1x2048xf32>
    %cst_3 = arith.constant 1.000000e+00 : f32
    %7 = vector.broadcast %cst_3 : f32 to vector<1x2048xf32>
    %8 = arith.addf %6, %7 : vector<1x2048xf32>
    %cst_4 = arith.constant 5.000000e-01 : f32
    %9 = vector.broadcast %cst_4 : f32 to vector<1x2048xf32>
    %10 = arith.mulf %9, %8 : vector<1x2048xf32>
    %11 = arith.mulf %1, %10 : vector<1x2048xf32>
    %c0_5 = arith.constant 0 : index
    %c0_6 = arith.constant 0 : index
    %12 = vector.load %arg3[%c0_5, %c0_6] : memref<1x2048xf32, #tpu.memory_space<vmem>>, vector<1x2048xf32>
    tpu.vector_store %arg3[%c0_5, %c0_6], %11 {strides = array<i32>} : memref<1x2048xf32, #tpu.memory_space<vmem>>, vector<1x2048xf32>,
    return
  }
  func.func @transform_0(%arg0: i32) -> (i32, i32) {
    %c0_i32 = arith.constant 0 : i32
    %c0_i32_0 = arith.constant 0 : i32
    %c0_i32_1 = arith.constant 0 : i32
    return %c0_i32, %c0_i32_0 : i32, i32
  }
  func.func @transform_1(%arg0: i32) -> (i32, i32) {
    %c0_i32 = arith.constant 0 : i32
    %c0_i32_0 = arith.constant 0 : i32
    return %arg0, %c0_i32 : i32, i32
  }
  func.func @transform_2(%arg0: i32) -> (i32, i32) {
    %c0_i32 = arith.constant 0 : i32
    %c0_i32_0 = arith.constant 0 : i32
    return %arg0, %c0_i32 : i32, i32
  }
}

</mosaic_0001>

<bundles_post_ra>
// kernel: tpu_custom_call.1
= control target key start
LH: loop header
LB: loop body
LE: loop exit
PB: predicated region body
PF: predicated region fallthrough
CT: control target
= control target key end

     0   :  { %s145_s9 = sld [smem:[#allocation0]]   ;;  %s167_s0 = inlined_call_operand.<no memory space> [shape: f32[1,1], index: 0, kind: input, shape index: {}]   ;;  %s168_s1 = inlined_call_operand.hbm [shape: f32[1,2048], index: 1, kind: input, shape index: {}]   ;;  %s169_s2 = inlined_call_operand.hbm [shape: f32[1,2048], index: 2, kind: output, shape index: {}]  }
   0x1   :  { %8 = vsyncpa [#allocation4], 0 }
   0x2   :  { %9 = vsyncpa [#allocation5], 0  ;;  %s128_s14 = smov [#allocation3]   ;;  %s82_s19 = scalar_lea.hbm %s168_s1, 256 }
   0x3   :  { %s21_s15 = sshll.u32 %s128_s14, 4  ;;  %s22_s15 = int_to_ptr.vmem [resolvable:$true] %s21_s15 }
   0x6   :  { %s72_s10 = sshll.u32 %s145_s9, 8 }
   0x7   :  { %s19_s13 = scalar_lea.hbm %s168_s1, %s72_s10 }
   0x8   :  { %s80_s16 = scalar_lea.hbm %s19_s13, 256 }
   0x9   :  { %p81_p0 = scmp.ne.s32.totalorder %s19_s13, %s80_s16  ;;  %p84_p1 = scmp.lt.s32.totalorder %s82_s19, %s80_s16 }
   0xb   :  { %p86_p2 = pnand %p84_p1, %p81_p0 }
   0xd   :  { %89 = shalt.err (!%p86_p2)
}
   0xe   :  { %s90_s20 = scalar_lea.vmem %s22_s15, 256  ;;  %p95_p4 = scmp.lt.s32.totalorder %s22_s15, %s22_s15 }
   0xf   :  { %p91_p3 = scmp.ne.s32.totalorder %s22_s15, %s90_s20  ;;  %p96_p5 = scmp.lt.s32.totalorder %s90_s20, %s90_s20 }
  0x11   :  { %p97_p6 = por %p96_p5, %p95_p4 }
  0x13   :  { %p98_p7 = pnand %p97_p6, %p91_p3 }
  0x15   :  { %101 = shalt.err (!%p98_p7)
}
  0x16   :  { %24 = dma.hbm_to_vmem [thread:$0]  %s19_s13, 256, %s22_s15, [#allocation4]  }
  0x17   :  { %124 = dma.done.wait [#allocation4], 256  }
  0x18   :  { %125 = vsyncadd [#allocation4], 4294967040  ;;  %v31_v0 = vstv %s167_s0  ;;  %v29_v1 = vld [vmem:[#allocation3] sm:$0xff]  ;;  %v30_v2 = vld [vmem:[#allocation3 + $0x8] sm:$0xff]  ;;  %s129_s1 = smov [#allocation6]   ;;  %s53_s25 = scalar_lea.hbm %s169_s2, %s72_s10 }
  0x19   :  { %v32_v3 = vmul.f32 %v31_v0, %v29_v1  ;;  %v33_v4 = vmul.f32 %v31_v0, %v30_v2  ;;  %s55_s23 = sshll.u32 %s129_s1, 4  ;;  %s56_s23 = int_to_ptr.vmem [resolvable:$true] %s55_s23 }
  0x1a   :  { %s102_s26 = scalar_lea.vmem %s56_s23, 256  ;;  %p107_p9 = scmp.lt.s32.totalorder %s56_s23, %s56_s23 }
  0x1b   :  { %v34_v5 = vmul.f32 0.5, %v32_v3  ;;  %v35_v6 = vmul.f32 0.5, %v33_v4  ;;  %p103_p8 = scmp.ne.s32.totalorder %s56_s23, %s102_s26  ;;  %p108_p10 = scmp.lt.s32.totalorder %s102_s26, %s102_s26 }
  0x1d   :  { %76 = vtanh.f32 %v34_v5  ;;  %p109_p11 = por %p108_p10, %p107_p9 }
  0x1e   :  { %78 = vtanh.f32 %v35_v6 }
  0x1f   :  { %p110_p12 = pnand %p109_p11, %p103_p8 }
  0x2a   :  { %v77_v7 = vpop.eup %76 }
  0x2b   :  { %v79_v8 = vpop.eup %78  ;;  %v38_v9 = vadd.f32 1.0, %v77_v7 }
  0x2c   :  { %v39_v10 = vadd.f32 1.0, %v79_v8 }
  0x2d   :  { %v40_v11 = vmul.f32 0.5, %v38_v9 }
  0x2e   :  { %v41_v12 = vmul.f32 0.5, %v39_v10 }
  0x2f   :  { %v42_v13 = vmul.f32 %v40_v11, %v29_v1 }
  0x30   :  { %v43_v14 = vmul.f32 %v41_v12, %v30_v2 }
  0x31   :  { %44 = vst [vmem:[#allocation6] sm:$0xff] %v42_v13 }
  0x32   :  { %45 = vst [vmem:[#allocation6 + $0x8] sm:$0xff] %v43_v14 }
  0x33   :  { %113 = shalt.err (!%p110_p12)
}
  0x34   :  { %s114_s27 = scalar_lea.hbm %s53_s25, 256  ;;  %s116_s30 = scalar_lea.hbm %s169_s2, 256 }
  0x35   :  { %p115_p13 = scmp.ne.s32.totalorder %s53_s25, %s114_s27  ;;  %p118_p0 = scmp.lt.s32.totalorder %s116_s30, %s114_s27 }
  0x37   :  { %p120_p1 = pnand %p118_p0, %p115_p13 }
  0x39   :  { %123 = shalt.err (!%p120_p1)
}
  0x3a   :  { %58 = dma.vmem_to_hbm [thread:$0]  %s56_s23, 256, %s53_s25, [#allocation5]  }
  0x3b   :  { %126 = dma.done.wait [#allocation5], 256  }
  0x3c   :  { %127 = vsyncadd [#allocation5], 4294967040 }
  0x3d   :  { %62 = vsyncpa [#allocation4], 1 }
  0x3e   :  { %63 = vsyncpa [#allocation5], 1 }

// kernel: tpu_custom_call.1
= control target key start
LH: loop header
LB: loop body
LE: loop exit
PB: predicated region body
PF: predicated region fallthrough
CT: control target
= control target key end

     0   :  { %8 = vsyncpa [#allocation4], 0  ;;  %s134_s0 = inlined_call_operand.<no memory space> [shape: f32[1,1], index: 0, kind: input, shape index: {}]   ;;  %s135_s1 = inlined_call_operand.hbm [shape: f32[1,2048], index: 1, kind: input, shape index: {}]   ;;  %s136_s2 = inlined_call_operand.hbm [shape: f32[1,2048], index: 2, kind: output, shape index: {}]  }
   0x1   :  { %9 = vsyncpa [#allocation5], 0  ;;  %s108_s9 = smov [#allocation3]  }
   0x2   :  { %s18_s10 = sshll.u32 %s108_s9, 4  ;;  %s19_s10 = int_to_ptr.vmem [resolvable:$true] %s18_s10 }
   0x3   :  { %s72_s11 = scalar_lea.vmem %s19_s10, 256  ;;  %p77_p1 = scmp.lt.s32.totalorder %s19_s10, %s19_s10 }
   0x4   :  { %p73_p0 = scmp.ne.s32.totalorder %s19_s10, %s72_s11  ;;  %p78_p2 = scmp.lt.s32.totalorder %s72_s11, %s72_s11 }
   0x6   :  { %p79_p3 = por %p78_p2, %p77_p1 }
   0x8   :  { %p80_p4 = pnand %p79_p3, %p73_p0 }
   0xa   :  { %83 = shalt.err (!%p80_p4)
}
   0xb   :  { %21 = dma.hbm_to_vmem [thread:$0]  %s135_s1, 256, %s19_s10, [#allocation4]  }
   0xc   :  { %104 = dma.done.wait [#allocation4], 256  }
   0xd   :  { %105 = vsyncadd [#allocation4], 4294967040  ;;  %v28_v0 = vstv %s134_s0  ;;  %v26_v1 = vld [vmem:[#allocation3] sm:$0xff]  ;;  %v27_v2 = vld [vmem:[#allocation3 + $0x8] sm:$0xff]  ;;  %s109_s1 = smov [#allocation6]  }
   0xe   :  { %v29_v3 = vmul.f32 %v28_v0, %v26_v1  ;;  %v30_v4 = vmul.f32 %v28_v0, %v27_v2  ;;  %s49_s16 = sshll.u32 %s109_s1, 4  ;;  %s50_s16 = int_to_ptr.vmem [resolvable:$true] %s49_s16 }
   0xf   :  { %s84_s0 = scalar_lea.vmem %s50_s16, 256  ;;  %p89_p6 = scmp.lt.s32.totalorder %s50_s16, %s50_s16 }
  0x10   :  { %v31_v5 = vmul.f32 0.5, %v29_v3  ;;  %v32_v6 = vmul.f32 0.5, %v30_v4  ;;  %p85_p5 = scmp.ne.s32.totalorder %s50_s16, %s84_s0  ;;  %p90_p7 = scmp.lt.s32.totalorder %s84_s0, %s84_s0 }
  0x12   :  { %60 = vtanh.f32 %v31_v5  ;;  %p91_p8 = por %p90_p7, %p89_p6 }
  0x13   :  { %62 = vtanh.f32 %v32_v6 }
  0x14   :  { %p92_p9 = pnand %p91_p8, %p85_p5 }
  0x1f   :  { %v61_v7 = vpop.eup %60 }
  0x20   :  { %v63_v8 = vpop.eup %62  ;;  %v35_v9 = vadd.f32 1.0, %v61_v7 }
  0x21   :  { %v36_v10 = vadd.f32 1.0, %v63_v8 }
  0x22   :  { %v37_v11 = vmul.f32 0.5, %v35_v9 }
  0x23   :  { %v38_v12 = vmul.f32 0.5, %v36_v10 }
  0x24   :  { %v39_v13 = vmul.f32 %v37_v11, %v26_v1 }
  0x25   :  { %v40_v14 = vmul.f32 %v38_v12, %v27_v2 }
  0x26   :  { %41 = vst [vmem:[#allocation6] sm:$0xff] %v39_v13 }
  0x27   :  { %42 = vst [vmem:[#allocation6 + $0x8] sm:$0xff] %v40_v14 }
  0x28   :  { %95 = shalt.err (!%p92_p9)
}
  0x29   :  { %52 = dma.vmem_to_hbm [thread:$0]  %s50_s16, 256, %s136_s2, [#allocation5]  }
  0x2a   :  { %106 = dma.done.wait [#allocation5], 256  }
  0x2b   :  { %107 = vsyncadd [#allocation5], 4294967040 }
  0x2c   :  { %56 = vsyncpa [#allocation4], 1 }
  0x2d   :  { %57 = vsyncpa [#allocation5], 1 }

</bundles_post_ra>
